<compile_context>
chip_gen: v7x
topology: tpu7x:2x2x1
jax: 0.10.0
libtpu: 0.0.40
codegen_flags: <defaults>
</compile_context>

<pallas_src>
import functools

import numpy as np
import jax
import jax.numpy as jnp
from jax import lax
from jax.experimental import pallas as pl
from jax.experimental.pallas import tpu as pltpu

_INV_SQRT2 = 0.7071067811865476
_BN_EPS = 1e-5
_LANE = 128


# ----------------------------- Pallas kernel ---------------------------------
def _conv_bn_kernel(p_ref, w_ref, scale_ref, shift_ref, o_ref, *, apply_gelu):
    """One im2col GEMM tile: (Cout, 9*Cin) @ (9*Cin, S_tile) + folded BN (+GELU).

    p_ref:     (9*Cin, S_tile)  bf16 im2col patches (batch-flattened columns)
    w_ref:     (Cout, 9*Cin)    bf16 reordered conv weights (VMEM-resident)
    scale_ref: (Cout, 1)        f32 folded BN scale
    shift_ref: (Cout, 1)        f32 folded BN shift (includes conv bias)
    o_ref:     (Cout, S_tile)
    """
    acc = jnp.dot(w_ref[...], p_ref[...], preferred_element_type=jnp.float32)
    y = acc * scale_ref[...] + shift_ref[...]
    if apply_gelu:
        # exact GELU (matches PyTorch nn.GELU() default, erf-based)
        y = 0.5 * y * (1.0 + lax.erf(y * _INV_SQRT2))
    o_ref[...] = y.astype(o_ref.dtype)


def _round_up(x, m):
    return (x + m - 1) // m * m


def _pick_spatial_tile(s_pad):
    # s_pad is always a multiple of 128, so this always returns >= 128
    # (or s_pad itself when it is small).
    for t in (2048, 1024, 512, 256, 128):
        if s_pad % t == 0:
            return t
    return s_pad


# ----------------------------- one conv stage ---------------------------------
def conv3x3_s2_bn(x_cnhw, w_oihw, conv_b, gamma, beta, run_mean, run_var,
                  *, apply_gelu, out_dtype=jnp.float32):
    """Fused 3x3 / stride-2 / pad-1 conv + inference BN (+ exact GELU).

    x_cnhw: (Cin, N, H, W); returns (Cout, N, Ho, Wo) in out_dtype.
    """
    Cin, N, H, W = x_cnhw.shape
    Cout = w_oihw.shape[0]
    Ho, Wo = (H + 1) // 2, (W + 1) // 2
    S = N * Ho * Wo
    K = 9 * Cin

    # --- glue: bf16, pad, im2col via 9 strided slices (pure layout, XLA) -----
    xp = jnp.pad(x_cnhw.astype(jnp.bfloat16), ((0, 0), (0, 0), (1, 1), (1, 1)))
    taps = [xp[:, :, kh:kh + 2 * Ho:2, kw:kw + 2 * Wo:2]        # (Cin,N,Ho,Wo)
            for kh in range(3) for kw in range(3)]
    patches = jnp.stack(taps, axis=0).reshape(K, S)              # (9*Cin, N*S)

    # pad the flattened column axis to a multiple of 128 -> lane-dense stores
    S_pad = _round_up(S, _LANE)
    if S_pad != S:
        patches = jnp.pad(patches, ((0, 0), (0, S_pad - S)))

    # --- glue: weights (Cout,Cin,3,3) -> (Cout, 9*Cin), matching tap order ---
    w2d = jnp.transpose(w_oihw, (0, 2, 3, 1)).reshape(Cout, K).astype(jnp.bfloat16)

    # --- glue: fold conv bias + inference BN into per-channel scale/shift ----
    scale = (gamma / jnp.sqrt(run_var + _BN_EPS)).astype(jnp.float32)
    shift = ((conv_b - run_mean) * scale + beta).astype(jnp.float32)
    scale = scale.reshape(Cout, 1)
    shift = shift.reshape(Cout, 1)

    st = _pick_spatial_tile(S_pad)
    grid = (S_pad // st,)

    out_itemsize = jnp.dtype(out_dtype).itemsize
    vmem_bytes = (2 * K * st * 2                       # double-buffered patches
                  + 2 * Cout * st * out_itemsize       # double-buffered output
                  + Cout * K * 2                       # weights (resident)
                  + 2 * Cout * 4)                      # scale / shift
    vmem_limit = int(min(max(4 * vmem_bytes, 16 << 20), 64 << 20))

    cost = pl.CostEstimate(
        flops=2 * S_pad * K * Cout,
        transcendentals=(S_pad * Cout) if apply_gelu else 0,
        bytes_accessed=int(patches.size * 2 + w2d.size * 2
                           + Cout * S_pad * out_itemsize),
    )

    kernel = functools.partial(_conv_bn_kernel, apply_gelu=apply_gelu)
    out = pl.pallas_call(
        kernel,
        grid_spec=pltpu.PrefetchScalarGridSpec(
            num_scalar_prefetch=0,
            grid=grid,
            in_specs=[
                pl.BlockSpec((K, st), lambda i: (0, i)),
                pl.BlockSpec((Cout, K), lambda i: (0, 0)),
                pl.BlockSpec((Cout, 1), lambda i: (0, 0)),
                pl.BlockSpec((Cout, 1), lambda i: (0, 0)),
            ],
            out_specs=pl.BlockSpec((Cout, st), lambda i: (0, i)),
        ),
        out_shape=jax.ShapeDtypeStruct((Cout, S_pad), out_dtype),
        compiler_params=pltpu.CompilerParams(
            dimension_semantics=("parallel",),
            vmem_limit_bytes=vmem_limit),
        cost_estimate=cost,
    )(patches, w2d, scale, shift)

    if S_pad != S:
        out = out[:, :S]                       # drop lane padding
    return out.reshape(Cout, N, Ho, Wo)        # stays in CNHW between stages


# ----------------------------- parameters -----------------------------------
def init_params(key, in_channels, out_channels):
    c1 = out_channels // 2
    ks = jax.random.split(key, 12)

    def conv_w(k, co, ci):
        bound = 1.0 / np.sqrt(ci * 9)
        return jax.random.uniform(k, (co, ci, 3, 3), jnp.float32, -bound, bound)

    def conv_bias(k, co, ci):
        bound = 1.0 / np.sqrt(ci * 9)
        return jax.random.uniform(k, (co,), jnp.float32, -bound, bound)

    return dict(
        w1=conv_w(ks[0], c1, in_channels), b1=conv_bias(ks[1], c1, in_channels),
        g1=1.0 + 0.1 * jax.random.normal(ks[2], (c1,), jnp.float32),
        be1=0.1 * jax.random.normal(ks[3], (c1,), jnp.float32),
        m1=0.1 * jax.random.normal(ks[4], (c1,), jnp.float32),
        v1=jax.random.uniform(ks[5], (c1,), jnp.float32, 0.5, 1.5),
        w2=conv_w(ks[6], out_channels, c1), b2=conv_bias(ks[7], out_channels, c1),
        g2=1.0 + 0.1 * jax.random.normal(ks[8], (out_channels,), jnp.float32),
        be2=0.1 * jax.random.normal(ks[9], (out_channels,), jnp.float32),
        m2=0.1 * jax.random.normal(ks[10], (out_channels,), jnp.float32),
        v2=jax.random.uniform(ks[11], (out_channels,), jnp.float32, 0.5, 1.5),
    )


# ----------------------------- forward pass ----------------------------------
def conv_embedding_forward(x_nchw, p):
    # NCHW -> CNHW; the transpose fuses with the f32->bf16 cast (minor dims
    # untouched), and lets every GEMM column axis span the whole batch.
    x = jnp.transpose(x_nchw, (1, 0, 2, 3)).astype(jnp.bfloat16)
    # stage-1 activation kept in bf16 -> half-size HBM round trip of the
    # intermediate; consumed by the stage-2 glue with zero relayout.
    y = conv3x3_s2_bn(x, p["w1"], p["b1"], p["g1"], p["be1"],
                      p["m1"], p["v1"], apply_gelu=True, out_dtype=jnp.bfloat16)
    y = conv3x3_s2_bn(y, p["w2"], p["b2"], p["g2"], p["be2"],
                      p["m2"], p["v2"], apply_gelu=False, out_dtype=jnp.float32)
    # CNHW -> NCHW on the final (smallest) tensor only.
    return jnp.transpose(y, (1, 0, 2, 3))      # (N, Cout, H/4, W/4)


# ----------------------------- pure-JAX reference ----------------------------
def _ref_forward(x_nchw, p):
    def block(x, w, b, g, be, m, v, gelu):
        y = lax.conv_general_dilated(x, w, (2, 2), ((1, 1), (1, 1)),
                                     dimension_numbers=("NCHW", "OIHW", "NCHW"))
        y = y + b[None, :, None, None]
        y = (y - m[None, :, None, None]) / jnp.sqrt(v + _BN_EPS)[None, :, None, None]
        y = y * g[None, :, None, None] + be[None, :, None, None]
        if gelu:
            y = 0.5 * y * (1.0 + lax.erf(y * _INV_SQRT2))
        return y

    y = block(x_nchw, p["w1"], p["b1"], p["g1"], p["be1"], p["m1"], p["v1"], True)
    y = block(y, p["w2"], p["b2"], p["g2"], p["be2"], p["m2"], p["v2"], False)
    return y


if __name__ == "__main__":
    key = jax.random.PRNGKey(0)
    kx, kp = jax.random.split(key)

    in_channels, out_channels = 4, 32
    x = jax.random.normal(kx, (2, in_channels, 16, 16), jnp.float32)  # NCHW
    params = init_params(kp, in_channels, out_channels)

    out = conv_embedding_forward(x, params)
    out = jax.block_until_ready(out)
    assert out.shape == (2, out_channels, 4, 4), out.shape

    ref = jax.block_until_ready(_ref_forward(x, params))
    # bf16 activations/weights with f32 accumulation -> loosened tolerance
    # vs. the pure-f32 reference.
    np.testing.assert_allclose(np.asarray(out), np.asarray(ref),
                               rtol=5e-2, atol=5e-2)
    print("KERNEL_OK")
</pallas_src>

<mosaic_0001>
module attributes {stable_mosaic.version = 11 : i64} {
  func.func @_conv_bn_kernel(%arg0: i32, %arg1: memref<36x128xbf16, #tpu.memory_space<vmem>>, %arg2: memref<16x36xbf16, #tpu.memory_space<vmem>>, %arg3: memref<16x1xf32, #tpu.memory_space<vmem>>, %arg4: memref<16x1xf32, #tpu.memory_space<vmem>>, %arg5: memref<16x128xbf16, #tpu.memory_space<vmem>>) attributes {dimension_semantics = [#tpu.dimension_semantics<parallel>], iteration_bounds = array<i64: 1>, scalar_prefetch = 0 : i64, scratch_operands = 0 : i64, tpu.core_type = #tpu.core_type<tc>, window_params = [{transform_indices = @transform_0, window_bounds = array<i64: 36, 128>}, {pipeline_mode = #tpu.pipeline_mode<synchronous>, transform_indices = @transform_1, window_bounds = array<i64: 16, 36>}, {pipeline_mode = #tpu.pipeline_mode<synchronous>, transform_indices = @transform_2, window_bounds = array<i64: 16, 1>}, {pipeline_mode = #tpu.pipeline_mode<synchronous>, transform_indices = @transform_3, window_bounds = array<i64: 16, 1>}, {transform_indices = @transform_4, window_bounds = array<i64: 16, 128>}]} {
    %c0 = arith.constant 0 : index
    %c0_0 = arith.constant 0 : index
    %0 = vector.load %arg2[%c0, %c0_0] : memref<16x36xbf16, #tpu.memory_space<vmem>>, vector<16x36xbf16>
    %c0_1 = arith.constant 0 : index
    %c0_2 = arith.constant 0 : index
    %1 = vector.load %arg1[%c0_1, %c0_2] : memref<36x128xbf16, #tpu.memory_space<vmem>>, vector<36x128xbf16>
    %cst = arith.constant dense<0.000000e+00> : vector<16x128xf32>
    %2 = tpu.matmul %0, %1, %cst {dimension_numbers = #tpu.dot_dimension_numbers<[1], [0], [0], [1], [0, 0, 1, 1], [], []>} : vector<16x36xbf16>, vector<36x128xbf16>, vector<16x128xf32> -> vector<16x128xf32>
    %c0_3 = arith.constant 0 : index
    %c0_4 = arith.constant 0 : index
    %3 = vector.load %arg3[%c0_3, %c0_4] : memref<16x1xf32, #tpu.memory_space<vmem>>, vector<16x1xf32>
    %4 = vector.broadcast %3 : vector<16x1xf32> to vector<16x128xf32>
    %5 = arith.mulf %2, %4 : vector<16x128xf32>
    %c0_5 = arith.constant 0 : index
    %c0_6 = arith.constant 0 : index
    %6 = vector.load %arg4[%c0_5, %c0_6] : memref<16x1xf32, #tpu.memory_space<vmem>>, vector<16x1xf32>
    %7 = vector.broadcast %6 : vector<16x1xf32> to vector<16x128xf32>
    %8 = arith.addf %5, %7 : vector<16x128xf32>
    %cst_7 = arith.constant 5.000000e-01 : f32
    %9 = vector.broadcast %cst_7 : f32 to vector<16x128xf32>
    %10 = arith.mulf %9, %8 : vector<16x128xf32>
    %cst_8 = arith.constant 0.707106769 : f32
    %11 = vector.broadcast %cst_8 : f32 to vector<16x128xf32>
    %12 = arith.mulf %8, %11 : vector<16x128xf32>
    %13 = math.erf %12 : vector<16x128xf32>
    %cst_9 = arith.constant 1.000000e+00 : f32
    %14 = vector.broadcast %cst_9 : f32 to vector<16x128xf32>
    %15 = arith.addf %14, %13 : vector<16x128xf32>
    %16 = arith.mulf %10, %15 : vector<16x128xf32>
    %17 = arith.truncf %16 : vector<16x128xf32> to vector<16x128xbf16>
    %c0_10 = arith.constant 0 : index
    %c0_11 = arith.constant 0 : index
    %18 = vector.load %arg5[%c0_10, %c0_11] : memref<16x128xbf16, #tpu.memory_space<vmem>>, vector<16x128xbf16>
    tpu.vector_store %arg5[%c0_10, %c0_11], %17 {strides = array<i32>} : memref<16x128xbf16, #tpu.memory_space<vmem>>, vector<16x128xbf16>,
    return
  }
  func.func @transform_0(%arg0: i32) -> (i32, i32) {
    %c0_i32 = arith.constant 0 : i32
    %c0_i32_0 = arith.constant 0 : i32
    return %c0_i32, %arg0 : i32, i32
  }
  func.func @transform_1(%arg0: i32) -> (i32, i32) {
    %c0_i32 = arith.constant 0 : i32
    %c0_i32_0 = arith.constant 0 : i32
    %c0_i32_1 = arith.constant 0 : i32
    return %c0_i32, %c0_i32_0 : i32, i32
  }
  func.func @transform_2(%arg0: i32) -> (i32, i32) {
    %c0_i32 = arith.constant 0 : i32
    %c0_i32_0 = arith.constant 0 : i32
    %c0_i32_1 = arith.constant 0 : i32
    return %c0_i32, %c0_i32_0 : i32, i32
  }
  func.func @transform_3(%arg0: i32) -> (i32, i32) {
    %c0_i32 = arith.constant 0 : i32
    %c0_i32_0 = arith.constant 0 : i32
    %c0_i32_1 = arith.constant 0 : i32
    return %c0_i32, %c0_i32_0 : i32, i32
  }
  func.func @transform_4(%arg0: i32) -> (i32, i32) {
    %c0_i32 = arith.constant 0 : i32
    %c0_i32_0 = arith.constant 0 : i32
    return %c0_i32, %arg0 : i32, i32
  }
}

</mosaic_0001>

<bundles_post_ra>
// kernel: tpu_custom_call.1
= control target key start
LH: loop header
LB: loop body
LE: loop exit
PB: predicated region body
PF: predicated region fallthrough
CT: control target
= control target key end

     0   :  { %v227_v1 = vmov 0.0   ;;  %vm228_vm0 = vmmov 0   ;;  %vm50_vm1 = vcmask 1041408   ;;  %v229_v6 = vmov 0   ;;  %s294_s0 = inlined_call_operand.vmem [shape: bf16[36,128], index: 0, kind: input, shape index: {}]   ;;  %s295_s1 = inlined_call_operand.vmem [shape: bf16[16,36], index: 1, kind: input, shape index: {}]   ;;  %s296_s2 = inlined_call_operand.vmem [shape: f32[16,1], index: 2, kind: input, shape index: {}]   ;;  %s297_s3 = inlined_call_operand.vmem [shape: f32[16,1], index: 3, kind: input, shape index: {}]   ;;  %s298_s4 = inlined_call_operand.hbm [shape: bf16[16,128], index: 4, kind: output, shape index: {}]  }
   0x1   :  { %v195_v0 = vld [vmem:[%s294_s0] sm:$0xff]   ;;  %177 = vmatprep.subr.bf16.mxu0 %v227_v1  ;;  %v196_v2 = vld [vmem:[%s294_s0 + $0x8] sm:$0xff]   ;;  %v197_v3 = vld [vmem:[%s294_s0 + $0x10] ss:$0 sps:$4 sm:$0x33]   ;;  %183 = vmatprep.mubr.msk.bf16.mxu0 %vm228_vm0, %v227_v1 }
   0x2   :  { %178 = vmatpush3.bf16.msra.mxu0 %v195_v0  ;;  %v95_v4 = vld [vmem:[%s296_s2] sm:$0xff]  ;;  %193 = vset.pattern.permute.xlu0 %v229_v6 }
   0x3   :  { %179 = vmatprep.subr.bf16.mxu0 %v227_v1  ;;  %v109_v5 = vld [vmem:[%s297_s3] sm:$0xff]  ;;  %194 = vset.pattern.permute.xlu1 %v229_v6 }
   0x4   :  { %9 = vsyncpa [#allocation3], 0  ;;  %99 = vperm.xlu0 %193, %v95_v4   ;;  %v52_v7 = vsel %vm50_vm1, %v197_v3, 0  ;;  %113 = vperm.xlu1 %194, %v109_v5   ;;  %v96_v8 = vld [vmem:[%s296_s2 + $0x8] sm:$0xff]  ;;  %v198_v10 = vld [vmem:[%s295_s1] sm:$0xff]   ;;  %vm46_vm2 = vcmask 293888  }
   0x5   :  { %v110_v9 = vld [vmem:[%s297_s3 + $0x8] sm:$0xff]  ;;  %s230_s1 = smov [#allocation2]  }
   0x6   :  { %180 = vmatpush3.bf16.msra.mxu0 %v196_v2  ;;  %s148_s2 = sshll.u32 %s230_s1, 4  ;;  %s149_s2 = int_to_ptr.vmem [resolvable:$true] %s148_s2 }
   0x7   :  { %181 = vmatprep.subr.bf16.mxu0 %v227_v1  ;;  %s203_s3 = scalar_lea.vmem %s149_s2, 128  ;;  %p208_p1 = scmp.lt.s32.totalorder %s149_s2, %s149_s2 }
   0x8   :  { %104 = vperm.xlu0 %193, %v96_v8   ;;  %118 = vperm.xlu1 %194, %v110_v9   ;;  %p204_p0 = scmp.ne.s32.totalorder %s149_s2, %s203_s3  ;;  %p209_p2 = scmp.lt.s32.totalorder %s203_s3, %s203_s3 }
   0xa   :  { %182 = vmatpush3.bf16.msra.mxu0 %v52_v7  ;;  %p210_p3 = por %p209_p2, %p208_p1 }
   0xc   :  { %p211_p4 = pnand %p210_p3, %p204_p0 }
   0xd   :  { %184 = vmatmul.mubr.msk.bf16.vlgmr.msra.gmra.mrb[0].mxu0 %vm46_vm2, %v198_v10 }
  0x83   :  { %v100_v11 = vpop.permute.xlu0 %99  ;;  %v114_v12 = vpop.permute.xlu1 %113 }
  0x87   :  { %v105_v16 = vpop.permute.xlu0 %104  ;;  %v119_v21 = vpop.permute.xlu1 %118 }
  0xe0   :  { %v88_v13 = vpop.f32.mrb[0].mxu0 }
  0xe1   :  { %v107_v14 = vmul.f32 %v100_v11, %v88_v13  ;;  %v185_v15 = vpop.f32.mrb[1].mxu0 }
  0xe2   :  { %v91_v17 = vpop.f32.mrb[2].mxu0 }
  0xe3   :  { %v121_v18 = vadd.f32 %v114_v12, %v107_v14  ;;  %v108_v19 = vmul.f32 %v105_v16, %v91_v17  ;;  %v186_v20 = vpop.f32.mrb[3].mxu0 }
  0xe5   :  { %v125_v22 = vmul.f32 0.70710677, %v121_v18  ;;  %v122_v23 = vadd.f32 %v119_v21, %v108_v19  ;;  %v123_v28 = vmul.f32 0.5, %v121_v18 }
  0xe7   :  { %199 = verf.f32 %v125_v22  ;;  %v126_v24 = vmul.f32 0.70710677, %v122_v23  ;;  %v124_v29 = vmul.f32 0.5, %v122_v23 }
  0xe9   :  { %201 = verf.f32 %v126_v24 }
  0xf1   :  { %v200_v25 = vpop.eup %199 }
  0xf2   :  { %v129_v26 = vadd.f32 1.0, %v200_v25 }
  0xf3   :  { %v202_v27 = vpop.eup %201 }
  0xf4   :  { %v130_v30 = vadd.f32 1.0, %v202_v27  ;;  %v131_v31 = vmul.f32 %v129_v26, %v123_v28 }
  0xf6   :  { %v132_v32 = vmul.f32 %v130_v30, %v124_v29 }
  0xf8   :  { %v171_v33 = vpack.c.bf16 %v132_v32, %v131_v31 }
  0xfa   :  { %172 = vst [vmem:[#allocation2] sm:$0xff] %v171_v33  }
  0xfb   :  { %214 = shalt.err (!%p211_p4)
}
  0xfc   :  { %s215_s6 = scalar_lea.hbm %s298_s4, 128 }
  0xfd   :  { %p216_p5 = scmp.ne.s32.totalorder %s298_s4, %s215_s6  ;;  %p219_p6 = scmp.lt.u32.totalorder %s215_s6, %s298_s4 }
  0xff   :  { %p221_p7 = pnand %p219_p6, %p216_p5 }
 0x101   :  { %224 = shalt.err (!%p221_p7)
}
 0x102   :  { %s231_s11 = smov 64   ;;  %s232_s12 = smov 4  }
 0x103   :  { %154 = dma.vmem_to_hbm [thread:$0]  %s149_s2, 128, %s298_s4, [#allocation3], %s231_s11, %s231_s11, %s232_s12  }
 0x104   :  { %225 = dma.done.wait [#allocation3], 128  }
 0x105   :  { %226 = vsyncadd [#allocation3], 4294967168 }
 0x106   :  { %158 = vsyncpa [#allocation3], 1 }

</bundles_post_ra>
